<compile_context>
chip_gen: v6e
topology: v6e:2x2x1
jax: 0.10.0
libtpu: 0.0.40
codegen_flags: <defaults>
</compile_context>

<pallas_src>
import jax
import jax.numpy as jnp
import numpy as np
from jax import lax
from jax.experimental import pallas as pl
from jax.experimental.pallas import tpu as pltpu

# ----------------------------- problem sizes --------------------------------
B = 2          # batch
S = 8          # sequence length
D = 128        # latent_doc_dim (lane-sized stand-in for 768)
N_LABELS = 16  # n_labels
N_PAD = 128    # n_labels padded to a full lane width for lane-dense stores
VOCAB = 64     # synthetic vocab for the embedding-lookup "backbone"
SCALE = False  # `scale` flag of the module (default False)


# ------------------------------ Pallas kernel --------------------------------
def target_attention_kernel(h_ref, q_ref, wt_ref, b_ref, o_ref):
    """Whole batch in one invocation.

    h_ref : (B, S, D)    bf16 last hidden states
    q_ref : (1, D)       bf16 target-attention query vector
    wt_ref: (D, N_PAD)   bf16 output weight, pre-transposed + lane-padded (W_out^T)
    b_ref : (1, N_PAD)   f32  output bias, lane-padded
    o_ref : (B, N_PAD)   f32  lane-dense logits (sliced to n_labels in the wrapper)
    """
    q = q_ref[...]          # (1, D)      bf16
    wt = wt_ref[...]        # (D, N_PAD)  bf16
    bias = b_ref[...]       # (1, N_PAD)  f32

    # B is tiny -> static unroll; for large B this would become a "parallel" grid
    # axis (megacore) instead.
    for b in range(B):
        Hb = h_ref[b]       # (S, D) bf16, natural layout (no transpose)

        # Energy scores E = Q x K^T, contracting the last dims of both operands
        # (MXU handles the transposed-RHS contraction natively).
        E = lax.dot_general(q, Hb, (((1,), (1,)), ((), ())),
                            preferred_element_type=jnp.float32)      # (1, S) f32
        if SCALE:
            E = E * (1.0 / float(np.sqrt(D)))

        # Softmax over the sequence axis, f32 math; divide goes to the EUP.
        m = jnp.max(E, axis=-1, keepdims=True)
        p = jnp.exp(E - m)
        denom = jnp.sum(p, axis=-1, keepdims=True)
        A = p * pl.reciprocal(denom, approx=True)                    # (1, S) f32

        # Context C = A x H  (bf16 MXU, f32 accumulation).
        C = jnp.dot(A.astype(jnp.bfloat16), Hb,
                    preferred_element_type=jnp.float32)              # (1, D) f32

        # Output layer: logits = C @ W_out^T + b, written lane-dense.
        logits = jnp.dot(C.astype(jnp.bfloat16), wt,
                         preferred_element_type=jnp.float32) + bias  # (1, N_PAD)

        o_ref[pl.ds(b, 1), :] = logits.astype(o_ref.dtype)


def transformer_model_forward(H, q_vec, W_out, b_out):
    """Target attention + output head on Pallas.  H: (B, S, D) float32."""
    # bf16 operands for the MXU / halved HBM+VMEM traffic (glue-side casts).
    H_b = H.astype(jnp.bfloat16)                                     # (B, S, D)
    q_b = q_vec.astype(jnp.bfloat16)                                 # (1, D)
    # W_out^T, lane-padded to 128 output columns (zeros beyond n_labels).
    Wt_pad = (jnp.zeros((D, N_PAD), jnp.float32)
              .at[:, :N_LABELS].set(W_out.T)).astype(jnp.bfloat16)   # (D, N_PAD)
    b_pad = (jnp.zeros((1, N_PAD), jnp.float32)
             .at[:, :N_LABELS].set(b_out[None, :]))                  # (1, N_PAD)

    out = pl.pallas_call(
        target_attention_kernel,
        out_shape=jax.ShapeDtypeStruct((B, N_PAD), jnp.float32),
        # Single invocation (empty grid): full arrays resident in VMEM.
        in_specs=[
            pl.BlockSpec((B, S, D), lambda: (0, 0, 0)),      # H (bf16)
            pl.BlockSpec((1, D), lambda: (0, 0)),            # q (bf16)
            pl.BlockSpec((D, N_PAD), lambda: (0, 0)),        # W_out^T (bf16)
            pl.BlockSpec((1, N_PAD), lambda: (0, 0)),        # bias (f32)
        ],
        out_specs=pl.BlockSpec((B, N_PAD), lambda: (0, 0)),
    )(H_b, q_b, Wt_pad, b_pad)

    # Slice away the lane padding -> (B, n_labels); no squeeze needed.
    return out[:, :N_LABELS]


# ------------------------------- reference -----------------------------------
def reference_forward(H, q_vec, W_out, b_out):
    """Pure-JAX f32 reference matching the PyTorch module semantics."""
    E = jnp.einsum("od,bsd->bos", q_vec, H)                 # (B, 1, S)
    if SCALE:
        E = E / jnp.sqrt(jnp.float32(D))
    A = jax.nn.softmax(E, axis=-1)
    C = jnp.einsum("bos,bsd->bod", A, H)                    # (B, 1, D)
    logits = jnp.einsum("bod,nd->bon", C, W_out) + b_out    # (B, 1, N)
    return jnp.squeeze(logits, axis=1)                      # (B, N)


# --------------------------------- main ---------------------------------------
if __name__ == "__main__":
    key = jax.random.PRNGKey(0)
    k_emb, k_ids, k_q, k_w = jax.random.split(key, 4)

    # TODO(synk): pretrained transformer backbone (DischargeBERT/ClinicalLongformer)
    # replaced by a deterministic embedding lookup producing the last hidden states.
    emb_table = jax.random.normal(k_emb, (VOCAB, D), dtype=jnp.float32) * 0.02
    input_ids = jax.random.randint(k_ids, (B, S), 0, VOCAB)
    H = emb_table[input_ids]                        # (B, S, D) == hidden_states[-1]
    # nn.Dropout(p=0.5) in eval mode -> identity.

    # Target-attention query vector (Attention module's learnable query).
    q_vec = jax.random.normal(k_q, (1, D), dtype=jnp.float32) * 0.05

    # output_layer: nn.Linear(D, n_labels), xavier_uniform_ weight, bias = 0.01
    limit = float(np.sqrt(6.0 / (D + N_LABELS)))
    W_out = jax.random.uniform(k_w, (N_LABELS, D), jnp.float32, -limit, limit)
    b_out = jnp.full((N_LABELS,), 0.01, dtype=jnp.float32)

    logits = transformer_model_forward(H, q_vec, W_out, b_out)
    logits = jax.block_until_ready(logits)

    ref = reference_forward(H, q_vec, W_out, b_out)
    assert logits.shape == (B, N_LABELS)
    # Tolerance loosened vs. pure-f32: inputs are bf16-quantized and the softmax
    # denominator uses the approximate EUP reciprocal (errors observed ~1e-4).
    assert np.allclose(np.asarray(logits), np.asarray(ref), atol=5e-3, rtol=5e-2)

    print("KERNEL_OK")
</pallas_src>

<mosaic_0001>
module attributes {stable_mosaic.version = 11 : i64} {
  func.func @target_attention_kernel(%arg0: memref<2x8x128xbf16, #tpu.memory_space<vmem>>, %arg1: memref<1x128xbf16, #tpu.memory_space<vmem>>, %arg2: memref<128x128xbf16, #tpu.memory_space<vmem>>, %arg3: memref<1x128xf32, #tpu.memory_space<vmem>>, %arg4: memref<2x128xf32, #tpu.memory_space<vmem>>) attributes {dimension_semantics = [], scalar_prefetch = 0 : i64, scratch_operands = 0 : i64, tpu.core_type = #tpu.core_type<tc>} {
    %c0 = arith.constant 0 : index
    %c0_0 = arith.constant 0 : index
    %0 = vector.load %arg1[%c0, %c0_0] : memref<1x128xbf16, #tpu.memory_space<vmem>>, vector<1x128xbf16>
    %c0_1 = arith.constant 0 : index
    %c0_2 = arith.constant 0 : index
    %1 = vector.load %arg2[%c0_1, %c0_2] : memref<128x128xbf16, #tpu.memory_space<vmem>>, vector<128x128xbf16>
    %c0_3 = arith.constant 0 : index
    %c0_4 = arith.constant 0 : index
    %2 = vector.load %arg3[%c0_3, %c0_4] : memref<1x128xf32, #tpu.memory_space<vmem>>, vector<1x128xf32>
    %c0_5 = arith.constant 0 : index
    %c0_6 = arith.constant 0 : index
    %c0_7 = arith.constant 0 : index
    %3 = vector.load %arg0[%c0_5, %c0_6, %c0_7] : memref<2x8x128xbf16, #tpu.memory_space<vmem>>, vector<1x8x128xbf16>
    %4 = vector.shape_cast %3 : vector<1x8x128xbf16> to vector<8x128xbf16>
    %cst = arith.constant dense<0.000000e+00> : vector<1x8xf32>
    %5 = tpu.matmul %0, %4, %cst {dimension_numbers = #tpu.dot_dimension_numbers<[1], [1], [0], [0], [0, 0, 1, 0], [], []>} : vector<1x128xbf16>, vector<8x128xbf16>, vector<1x8xf32> -> vector<1x8xf32>
    %cst_8 = arith.constant dense<0xFF800000> : vector<1xf32>
    %6 = vector.multi_reduction <maximumf>, %5, %cst_8 [1] : vector<1x8xf32> to vector<1xf32>
    %7 = vector.shape_cast %6 : vector<1xf32> to vector<1x1xf32>
    %8 = vector.broadcast %7 : vector<1x1xf32> to vector<1x8xf32>
    %9 = arith.subf %5, %8 : vector<1x8xf32>
    %10 = math.exp %9 : vector<1x8xf32>
    %cst_9 = arith.constant dense<0.000000e+00> : vector<1xf32>
    %11 = vector.multi_reduction <add>, %10, %cst_9 [1] : vector<1x8xf32> to vector<1xf32>
    %12 = vector.shape_cast %11 : vector<1xf32> to vector<1x1xf32>
    %13 = tpu.reciprocal %12 {approx = true} : vector<1x1xf32> -> vector<1x1xf32>
    %14 = vector.broadcast %13 : vector<1x1xf32> to vector<1x8xf32>
    %15 = arith.mulf %10, %14 : vector<1x8xf32>
    %16 = arith.truncf %15 : vector<1x8xf32> to vector<1x8xbf16>
    %cst_10 = arith.constant dense<0.000000e+00> : vector<1x128xf32>
    %17 = tpu.matmul %16, %4, %cst_10 {dimension_numbers = #tpu.dot_dimension_numbers<[1], [0], [0], [1], [0, 0, 1, 1], [], []>} : vector<1x8xbf16>, vector<8x128xbf16>, vector<1x128xf32> -> vector<1x128xf32>
    %18 = arith.truncf %17 : vector<1x128xf32> to vector<1x128xbf16>
    %cst_11 = arith.constant dense<0.000000e+00> : vector<1x128xf32>
    %19 = tpu.matmul %18, %1, %cst_11 {dimension_numbers = #tpu.dot_dimension_numbers<[1], [0], [0], [1], [0, 0, 1, 1], [], []>} : vector<1x128xbf16>, vector<128x128xbf16>, vector<1x128xf32> -> vector<1x128xf32>
    %20 = arith.addf %19, %2 : vector<1x128xf32>
    %c0_12 = arith.constant 0 : index
    %c0_13 = arith.constant 0 : index
    %21 = vector.load %arg4[%c0_12, %c0_13] : memref<2x128xf32, #tpu.memory_space<vmem>>, vector<1x128xf32>
    tpu.vector_store %arg4[%c0_12, %c0_13], %20 {strides = array<i32>} : memref<2x128xf32, #tpu.memory_space<vmem>>, vector<1x128xf32>,
    %c1 = arith.constant 1 : index
    %c0_14 = arith.constant 0 : index
    %c0_15 = arith.constant 0 : index
    %22 = vector.load %arg0[%c1, %c0_14, %c0_15] : memref<2x8x128xbf16, #tpu.memory_space<vmem>>, vector<1x8x128xbf16>
    %23 = vector.shape_cast %22 : vector<1x8x128xbf16> to vector<8x128xbf16>
    %cst_16 = arith.constant dense<0.000000e+00> : vector<1x8xf32>
    %24 = tpu.matmul %0, %23, %cst_16 {dimension_numbers = #tpu.dot_dimension_numbers<[1], [1], [0], [0], [0, 0, 1, 0], [], []>} : vector<1x128xbf16>, vector<8x128xbf16>, vector<1x8xf32> -> vector<1x8xf32>
    %cst_17 = arith.constant dense<0xFF800000> : vector<1xf32>
    %25 = vector.multi_reduction <maximumf>, %24, %cst_17 [1] : vector<1x8xf32> to vector<1xf32>
    %26 = vector.shape_cast %25 : vector<1xf32> to vector<1x1xf32>
    %27 = vector.broadcast %26 : vector<1x1xf32> to vector<1x8xf32>
    %28 = arith.subf %24, %27 : vector<1x8xf32>
    %29 = math.exp %28 : vector<1x8xf32>
    %cst_18 = arith.constant dense<0.000000e+00> : vector<1xf32>
    %30 = vector.multi_reduction <add>, %29, %cst_18 [1] : vector<1x8xf32> to vector<1xf32>
    %31 = vector.shape_cast %30 : vector<1xf32> to vector<1x1xf32>
    %32 = tpu.reciprocal %31 {approx = true} : vector<1x1xf32> -> vector<1x1xf32>
    %33 = vector.broadcast %32 : vector<1x1xf32> to vector<1x8xf32>
    %34 = arith.mulf %29, %33 : vector<1x8xf32>
    %35 = arith.truncf %34 : vector<1x8xf32> to vector<1x8xbf16>
    %cst_19 = arith.constant dense<0.000000e+00> : vector<1x128xf32>
    %36 = tpu.matmul %35, %23, %cst_19 {dimension_numbers = #tpu.dot_dimension_numbers<[1], [0], [0], [1], [0, 0, 1, 1], [], []>} : vector<1x8xbf16>, vector<8x128xbf16>, vector<1x128xf32> -> vector<1x128xf32>
    %37 = arith.truncf %36 : vector<1x128xf32> to vector<1x128xbf16>
    %cst_20 = arith.constant dense<0.000000e+00> : vector<1x128xf32>
    %38 = tpu.matmul %37, %1, %cst_20 {dimension_numbers = #tpu.dot_dimension_numbers<[1], [0], [0], [1], [0, 0, 1, 1], [], []>} : vector<1x128xbf16>, vector<128x128xbf16>, vector<1x128xf32> -> vector<1x128xf32>
    %39 = arith.addf %38, %2 : vector<1x128xf32>
    %c1_21 = arith.constant 1 : index
    %c0_22 = arith.constant 0 : index
    %40 = vector.load %arg4[%c1_21, %c0_22] : memref<2x128xf32, #tpu.memory_space<vmem>>, vector<1x128xf32>
    tpu.vector_store %arg4[%c1_21, %c0_22], %39 {strides = array<i32>} : memref<2x128xf32, #tpu.memory_space<vmem>>, vector<1x128xf32>,
    return
  }
}

</mosaic_0001>

<bundles_post_ra>
// kernel: tpu_custom_call.1
= control target key start
LH: loop header
LB: loop body
LE: loop exit
PB: predicated region body
PF: predicated region fallthrough
CT: control target
= control target key end

     0   :  { %9 = vsyncpa [#allocation3], 0  ;;  %s687_s0 = inlined_call_operand.hbm [shape: bf16[2,8,128], index: 0, kind: input, shape index: {}]   ;;  %s688_s1 = inlined_call_operand.vmem [shape: bf16[1,128], index: 1, kind: input, shape index: {}]   ;;  %s689_s2 = inlined_call_operand.hbm [shape: bf16[128,128], index: 2, kind: input, shape index: {}]   ;;  %s690_s3 = inlined_call_operand.vmem [shape: f32[1,128], index: 3, kind: input, shape index: {}]   ;;  %s691_s4 = inlined_call_operand.hbm [shape: f32[2,128], index: 4, kind: output, shape index: {}]  }
   0x1   :  { %10 = vsyncpa [#allocation6], 0 }
   0x2   :  { %11 = vsyncpa [#allocation4], 0  ;;  %s604_s15 = smov [#allocation2]  }
   0x3   :  { %s17_s16 = sshll.u32 %s604_s15, 4  ;;  %s18_s16 = int_to_ptr.vmem [resolvable:$true] %s17_s16 }
   0x4   :  { %s546_s17 = scalar_lea.vmem %s18_s16, 128  ;;  %p551_p1 = scmp.lt.s32.totalorder %s18_s16, %s18_s16 }
   0x5   :  { %p547_p0 = scmp.ne.s32.totalorder %s18_s16, %s546_s17  ;;  %p552_p2 = scmp.lt.s32.totalorder %s546_s17, %s546_s17 }
   0x7   :  { %p553_p3 = por %p552_p2, %p551_p1 }
   0x9   :  { %p554_p4 = pnand %p553_p3, %p547_p0 }
   0xb   :  { %557 = shalt.err (!%p554_p4)
}
   0xc   :  { %s605_s18 = smov 64   ;;  %s606_s19 = smov 4  }
   0xd   :  { %23 = dma.hbm_to_vmem [thread:$0]  %s687_s0, 128, %s18_s16, [#allocation3], %s605_s18, %s605_s18, %s606_s19  }
   0xe   :  { %s607_s22 = smov [#allocation5]  }
   0xf   :  { %s31_s23 = sshll.u32 %s607_s22, 4  ;;  %s32_s23 = int_to_ptr.vmem [resolvable:$true] %s31_s23 }
  0x10   :  { %s566_s24 = scalar_lea.vmem %s32_s23, 1024  ;;  %p571_p6 = scmp.lt.s32.totalorder %s32_s23, %s32_s23 }
  0x11   :  { %p567_p5 = scmp.ne.s32.totalorder %s32_s23, %s566_s24  ;;  %p572_p7 = scmp.lt.s32.totalorder %s566_s24, %s566_s24 }
  0x13   :  { %p573_p8 = por %p572_p7, %p571_p6 }
  0x15   :  { %p574_p9 = pnand %p573_p8, %p567_p5 }
  0x17   :  { %577 = shalt.err (!%p574_p9)
}
  0x18   :  { %37 = dma.hbm_to_vmem [thread:$0]  %s689_s2, 1024, %s32_s23, [#allocation6], %s605_s18, %s605_s18, %s606_s19  }
  0x19   :  { %598 = dma.done.wait [#allocation3], 128  }
  0x1a   :  { %599 = vsyncadd [#allocation3], 4294967168 }
  0x1b   :  { %600 = dma.done.wait [#allocation6], 1024  }
  0x1c   :  { %601 = vsyncadd [#allocation6], 4294966272  ;;  %v608_v0 = vmov 0.0   ;;  %vm609_vm0 = vmmov 0   ;;  %v65_v1 = vld [vmem:[#allocation2] sm:$0xf] }
  0x1d   :  { %451 = vmatprep.subr.bf16.mxu1 %v608_v0  ;;  %483 = vmatprep.subr.bf16.mxu0 %v608_v0  ;;  %v258_v2 = vld [vmem:[#allocation2 + $0x4] sm:$0xf]  ;;  %vm123_vm1 = vcmask 1043456   ;;  %v47_v3 = vld [vmem:[%s688_s1] sm:$0x1]  ;;  %vm106_vm2 = vcmask 57344  }
  0x1e   :  { %453 = vmatprep.mubr.msk.bf16.mxu1 %vm609_vm0, %v608_v0  ;;  %485 = vmatprep.mubr.msk.bf16.mxu0 %vm609_vm0, %v608_v0  ;;  %v125_v4 = vsel %vm123_vm1, %v65_v1, 0  ;;  %v315_v5 = vsel %vm123_vm1, %v258_v2, 0  ;;  %vm119_vm3 = vcmask 64512   ;;  %v522_v30 = vld [vmem:[#allocation5 + $0x38] sm:$0xff]   ;;  %v523_v34 = vld [vmem:[#allocation5 + $0x30] sm:$0xff]   ;;  %v524_v36 = vld [vmem:[#allocation5 + $0x28] sm:$0xff]  }
  0x1f   :  { %452 = vmatpush3.bf16.xpose.msra.mxu1 %v65_v1  ;;  %484 = vmatpush3.bf16.xpose.msra.mxu0 %v258_v2  ;;  %v525_v37 = vld [vmem:[#allocation5 + $0x20] sm:$0xff]   ;;  %v526_v38 = vld [vmem:[#allocation5 + $0x18] sm:$0xff]   ;;  %v527_v39 = vld [vmem:[#allocation5 + $0x10] sm:$0xff]   ;;  %s610_s28 = smov [#allocation7]  }
  0x20   :  { %457 = vmatprep.subr.bf16.mxu1 %v608_v0  ;;  %489 = vmatprep.subr.bf16.mxu0 %v608_v0  ;;  %v528_v40 = vld [vmem:[#allocation5 + $0x8] sm:$0xff]   ;;  %v529_v41 = vld [vmem:[#allocation5] sm:$0xff]   ;;  %v64_v52 = vld [vmem:[%s690_s3] sm:$0x1]  ;;  %s405_s29 = sshll.u32 %s610_s28, 4  ;;  %s406_s29 = int_to_ptr.vmem [resolvable:$true] %s405_s29 }
  0x21   :  { %s578_s30 = scalar_lea.vmem %s406_s29, 32  ;;  %p583_p11 = scmp.lt.s32.totalorder %s406_s29, %s406_s29 }
  0x22   :  { %p579_p10 = scmp.ne.s32.totalorder %s406_s29, %s578_s30  ;;  %p584_p12 = scmp.lt.s32.totalorder %s578_s30, %s578_s30 }
  0x24   :  { %p585_p13 = por %p584_p12, %p583_p11 }
  0x26   :  { %454 = vmatmul.mubr.bf16.vlgmr.msra.gmra.mxu1 %v47_v3  ;;  %486 = vmatmul.mubr.bf16.vlgmr.msra.gmra.mxu0 %v47_v3  ;;  %p586_p0 = pnand %p585_p13, %p579_p10 }
  0x27   :  { %458 = vmatpush3.bf16.msra.mxu1 %v125_v4  ;;  %490 = vmatpush3.bf16.msra.mxu0 %v315_v5 }
  0x28   :  { %459 = vmatprep.mubr.msk.bf16.mxu1 %vm609_vm0, %v608_v0  ;;  %491 = vmatprep.mubr.msk.bf16.mxu0 %vm609_vm0, %v608_v0 }
  0x29   :  { %463 = vmatprep.subr.bf16.mxu1 %v608_v0  ;;  %495 = vmatprep.subr.bf16.mxu0 %v608_v0 }
  0xe6   :  { %v100_v6 = vpop.f32.mrf.mxu1  ;;  %v293_v7 = vpop.f32.mrf.mxu0 }
  0xe7   :  { %v107_v8 = vsel %vm106_vm2, %v100_v6, -inf  ;;  %v299_v11 = vsel %vm106_vm2, %v293_v7, -inf }
  0xe8   :  { %v487_v9 = vpop.f32.mrf.mxu0  ;;  %108 = vmax.xlane.f32.xlu0 %v107_v8  ;;  %v455_v10 = vpop.f32.mrf.mxu1 }
  0xea   :  { %v103_v12 = vpop.f32.mrf.mxu1  ;;  %v296_v13 = vpop.f32.mrf.mxu0 }
  0xec   :  { %v488_v14 = vpop.f32.mrf.mxu0  ;;  %300 = vmax.xlane.f32.xlu0 %v299_v11  ;;  %v456_v15 = vpop.f32.mrf.mxu1 }
 0x171   :  { %v109_v16 = vpop.xlane.xlu0 %108 }
 0x172   :  { %v110_v17 = vsub.f32 %v100_v6, %v109_v16 }
 0x174   :  { %v111_v18 = vmul.f32 1.442695, %v110_v17 }
 0x175   :  { %v301_v19 = vpop.xlane.xlu0 %300 }
 0x176   :  { %530 = vpow2.f32 %v111_v18  ;;  %v302_v20 = vsub.f32 %v293_v7, %v301_v19 }
 0x178   :  { %v303_v21 = vmul.f32 1.442695, %v302_v20 }
 0x17a   :  { %532 = vpow2.f32 %v303_v21 }
 0x183   :  { %v531_v22 = vpop.eup %530 }
 0x184   :  { %v113_v23 = vsel %vm106_vm2, %v531_v22, 0.0 }
 0x185   :  { %114 = vadd.xlane.f32.xlu1 %v113_v23 }
 0x187   :  { %v533_v24 = vpop.eup %532 }
 0x188   :  { %v305_v25 = vsel %vm106_vm2, %v533_v24, 0.0 }
 0x189   :  { %306 = vadd.xlane.f32.xlu1 %v305_v25 }
 0x20e   :  { %v115_v26 = vpop.xlane.xlu1 %114 }
 0x20f   :  { %534 = vrcp.f32 %v115_v26 }
 0x212   :  { %v307_v27 = vpop.xlane.xlu1 %306 }
 0x213   :  { %536 = vrcp.f32 %v307_v27 }
 0x21c   :  { %v535_v28 = vpop.eup %534 }
 0x21d   :  { %v117_v29 = vmul.f32 %v535_v28, %v531_v22 }
 0x21f   :  { %v118_v31 = vpack.c.bf16 %v117_v29, %v117_v29 }
 0x220   :  { %v537_v32 = vpop.eup %536 }
 0x221   :  { %460 = vmatmul.mubr.msk.bf16.vlgmr.msra.gmra.mxu1 %vm119_vm3, %v118_v31  ;;  %v309_v33 = vmul.f32 %v537_v32, %v533_v24 }
 0x222   :  { %464 = vmatpush3.bf16.msra.mxu1 %v522_v30  ;;  %479 = vmatprep.mubr.msk.bf16.mxu1 %vm609_vm0, %v608_v0 }
 0x223   :  { %v310_v35 = vpack.c.bf16 %v309_v33, %v309_v33  ;;  %465 = vmatprep.subr.bf16.mxu1 %v608_v0 }
 0x225   :  { %492 = vmatmul.mubr.msk.bf16.vlgmr.msra.gmra.mxu0 %vm119_vm3, %v310_v35 }
 0x226   :  { %466 = vmatpush3.bf16.msra.mxu1 %v523_v34  ;;  %496 = vmatpush3.bf16.msra.mxu0 %v522_v30 }
 0x227   :  { %467 = vmatprep.subr.bf16.mxu1 %v608_v0  ;;  %497 = vmatprep.subr.bf16.mxu0 %v608_v0 }
 0x228   :  { %511 = vmatprep.mubr.msk.bf16.mxu0 %vm609_vm0, %v608_v0 }
 0x22a   :  { %468 = vmatpush3.bf16.msra.mxu1 %v524_v36  ;;  %498 = vmatpush3.bf16.msra.mxu0 %v523_v34 }
 0x22b   :  { %469 = vmatprep.subr.bf16.mxu1 %v608_v0  ;;  %499 = vmatprep.subr.bf16.mxu0 %v608_v0 }
 0x22e   :  { %470 = vmatpush3.bf16.msra.mxu1 %v525_v37  ;;  %500 = vmatpush3.bf16.msra.mxu0 %v524_v36 }
 0x22f   :  { %471 = vmatprep.subr.bf16.mxu1 %v608_v0  ;;  %501 = vmatprep.subr.bf16.mxu0 %v608_v0 }
 0x232   :  { %472 = vmatpush3.bf16.msra.mxu1 %v526_v38  ;;  %502 = vmatpush3.bf16.msra.mxu0 %v525_v37 }
 0x233   :  { %473 = vmatprep.subr.bf16.mxu1 %v608_v0  ;;  %503 = vmatprep.subr.bf16.mxu0 %v608_v0 }
 0x236   :  { %474 = vmatpush3.bf16.msra.mxu1 %v527_v39  ;;  %504 = vmatpush3.bf16.msra.mxu0 %v526_v38 }
 0x237   :  { %475 = vmatprep.subr.bf16.mxu1 %v608_v0  ;;  %505 = vmatprep.subr.bf16.mxu0 %v608_v0 }
 0x23a   :  { %476 = vmatpush3.bf16.msra.mxu1 %v528_v40  ;;  %506 = vmatpush3.bf16.msra.mxu0 %v527_v39 }
 0x23b   :  { %477 = vmatprep.subr.bf16.mxu1 %v608_v0  ;;  %507 = vmatprep.subr.bf16.mxu0 %v608_v0 }
 0x23e   :  { %508 = vmatpush3.bf16.msra.mxu0 %v528_v40  ;;  %478 = vmatpush3.bf16.msra.mxu1 %v529_v41 }
 0x23f   :  { %509 = vmatprep.subr.bf16.mxu0 %v608_v0 }
 0x242   :  { %510 = vmatpush3.bf16.msra.mxu0 %v529_v41 }
 0x2e1   :  { %v161_v42 = vpop.f32.mrf.mxu1 }
 0x2e2   :  { %v167_v43 = vpack.c.bf16 %v161_v42, %v161_v42 }
 0x2e3   :  { %v461_v44 = vpop.f32.mrf.mxu1 }
 0x2e4   :  { %480 = vmatmul.mubr.bf16.vlgmr.msra.gmra.mxu1 %v167_v43 }
 0x2e5   :  { %v164_v45 = vpop.f32.mrf.mxu1  ;;  %v351_v46 = vpop.f32.mrf.mxu0 }
 0x2e6   :  { %v357_v47 = vpack.c.bf16 %v351_v46, %v351_v46 }
 0x2e7   :  { %v462_v48 = vpop.f32.mrf.mxu1  ;;  %v493_v49 = vpop.f32.mrf.mxu0 }
 0x2e8   :  { %512 = vmatmul.mubr.bf16.vlgmr.msra.gmra.mxu0 %v357_v47 }
 0x2e9   :  { %v354_v50 = vpop.f32.mrf.mxu0 }
 0x2eb   :  { %v494_v51 = vpop.f32.mrf.mxu0 }
 0x3a4   :  { %v250_v53 = vpop.f32.mrf.mxu1 }
 0x3a5   :  { %v251_v54 = vadd.f32 %v250_v53, %v64_v52 }
 0x3a6   :  { %v481_v55 = vpop.f32.mrf.mxu1 }
 0x3a7   :  { %256 = vst [vmem:[#allocation7] sm:$0x1] %v251_v54 }
 0x3a8   :  { %v253_v56 = vpop.f32.mrf.mxu1  ;;  %v392_v57 = vpop.f32.mrf.mxu0 }
 0x3a9   :  { %v393_v58 = vadd.f32 %v392_v57, %v64_v52 }
 0x3aa   :  { %v482_v59 = vpop.f32.mrf.mxu1  ;;  %v513_v60 = vpop.f32.mrf.mxu0 }
 0x3ab   :  { %398 = vst [vmem:[#allocation7 + $0x1] sm:$0x1] %v393_v58 }
 0x3ac   :  { %v395_v61 = vpop.f32.mrf.mxu0 }
 0x3ad   :  { %589 = shalt.err (!%p586_p0)
}
 0x3ae   :  { %408 = dma.vmem_to_hbm [thread:$0]  %s406_s29, 32, %s691_s4, [#allocation4]   ;;  %v514_v62 = vpop.f32.mrf.mxu0 }
 0x3af   :  { %602 = dma.done.wait [#allocation4], 32  }
 0x3b0   :  { %603 = vsyncadd [#allocation4], 4294967264 }
 0x3b1   :  { %412 = vsyncpa [#allocation3], 1 }
 0x3b2   :  { %413 = vsyncpa [#allocation6], 1 }
 0x3b3   :  { %414 = vsyncpa [#allocation4], 1 }

</bundles_post_ra>
